<compile_context>
chip_gen: v7x
topology: tpu7x:2x2x1
jax: 0.10.0
libtpu: 0.0.40
codegen_flags: <defaults>
</compile_context>

<pallas_src>
from functools import partial

import jax
import jax.numpy as jnp
from jax.experimental import pallas as pl
from jax.experimental.pallas import tpu as pltpu


# ----------------------------------------------------------------------------
# Kernels
# ----------------------------------------------------------------------------
def _poly_q_fused_kernel(x_ref, w_ref, b_ref, o_ref, feat_ref, *, degree, op_dtype):
    """Small-F path: build the full feature slab in VMEM, one K=F matmul.

    x_ref:    [Bb, D] f32
    w_ref:    [F, A_pad] op_dtype   (packed, transposed, lane-padded)
    b_ref:    [1, A_pad] f32
    o_ref:    [Bb, A_pad] out dtype
    feat_ref: [Bb, F] f32 VMEM scratch
    """
    x = x_ref[...]
    Bb, D = x.shape

    feat_ref[:, 0:D] = x
    a = x
    off = D
    for _ in range(degree - 1):
        # Lane-dense ordering: large factor (D^(n-1)) lands on the lane axis.
        a = (x[:, :, None] * a[:, None, :]).reshape(Bb, D * a.shape[1])
        feat_ref[:, off:off + a.shape[1]] = a
        off += a.shape[1]

    acc = jnp.dot(feat_ref[...].astype(op_dtype), w_ref[...],
                  preferred_element_type=jnp.float32)
    o_ref[...] = (acc + b_ref[...]).astype(o_ref.dtype)


def _poly_q_chunked_kernel(x_ref, *refs, degree, chunk_outer, op_dtype):
    """Large-F path: per-degree dots, top degree K-chunked along its outer axis.

    refs = (w_1 [D,A_pad], ..., w_degree [D^degree,A_pad], bias, out, acc_scratch)
    """
    *w_refs, b_ref, o_ref, acc_ref = refs
    x = x_ref[...]
    Bb, D = x.shape

    # Degree-1.
    acc_ref[...] = jnp.dot(x.astype(op_dtype), w_refs[0][...],
                           preferred_element_type=jnp.float32)

    # Degrees 2 .. degree-1 : whole-block dots (accumulate in VMEM f32 scratch).
    a = x
    for n in range(2, degree):
        a = (x[:, :, None] * a[:, None, :]).reshape(Bb, D * a.shape[1])
        acc_ref[...] += jnp.dot(a.astype(op_dtype), w_refs[n - 1][...],
                                preferred_element_type=jnp.float32)

    # Top degree: chunk over the outer D axis -> contiguous weight-row slices.
    prev = a.shape[1]
    w_top = w_refs[degree - 1]
    for j0 in range(0, D, chunk_outer):
        cj = min(chunk_outer, D - j0)
        slab = (x[:, j0:j0 + cj, None] * a[:, None, :]).reshape(Bb, cj * prev)
        acc_ref[...] += jnp.dot(slab.astype(op_dtype),
                                w_top[j0 * prev:(j0 + cj) * prev, :],
                                preferred_element_type=jnp.float32)

    o_ref[...] = (acc_ref[...] + b_ref[...]).astype(o_ref.dtype)


# ----------------------------------------------------------------------------
# One-time parameter packing (do NOT call per forward)
# ----------------------------------------------------------------------------
def pack_params(w_lin, b_lin, obs_dim, degree, *,
                op_dtype=jnp.bfloat16, fuse_max_f=1024):
    """w_lin: [act_num, F] nn.Linear weight; b_lin: [act_num]."""
    A, F = w_lin.shape
    sizes = [obs_dim ** n for n in range(1, degree + 1)]
    assert F == sum(sizes), "weight/feature dim mismatch"
    A_pad = ((A + 127) // 128) * 128

    w_t = jnp.transpose(jnp.asarray(w_lin, jnp.float32))        # [F, A]
    w_t = jnp.pad(w_t, ((0, 0), (0, A_pad - A)))
    bias = jnp.pad(jnp.asarray(b_lin, jnp.float32).reshape(1, A),
                   ((0, 0), (0, A_pad - A)))

    fused = (degree == 1) or (F <= fuse_max_f)
    if fused:
        weights = (w_t.astype(op_dtype),)                        # single [F, A_pad]
    else:
        blocks, off = [], 0
        for s in sizes:
            blocks.append(w_t[off:off + s, :].astype(op_dtype))  # per-degree blocks
            off += s
        weights = tuple(blocks)

    return dict(mode="fused" if fused else "chunked", weights=weights, bias=bias,
                act_num=A, obs_dim=obs_dim, degree=degree,
                op_dtype=op_dtype, feat_dim=F)


# ----------------------------------------------------------------------------
# Wrapper
# ----------------------------------------------------------------------------
def _vmem_capacity_bytes():
    try:
        info = pltpu.get_tpu_info()
        for attr in ("vmem_capacity_bytes", "vmem_size_bytes", "vmem_bytes"):
            v = getattr(info, attr, None)
            if v:
                return int(v)
    except Exception:
        pass
    return 64 << 20   # conservative (v7x-sized per-core VMEM)


def _resident_spec(shape, single_buffer):
    """BlockSpec for a grid-invariant (resident) operand."""
    if single_buffer:
        try:
            return pl.BlockSpec(shape, lambda i: (0, 0),
                                pipeline_mode=pl.Buffered(1))
        except Exception:
            pass
    return pl.BlockSpec(shape, lambda i: (0, 0))


def action_value_dis_forward(obs, params, *, block_b=None, out_dtype=None,
                             single_buffer_weights=True):
    """obs: [B, obs_dim] -> [B, act_num] Q-values."""
    mode, weights, bias = params["mode"], params["weights"], params["bias"]
    degree, D, A = params["degree"], params["obs_dim"], params["act_num"]
    op_dtype, F = params["op_dtype"], params["feat_dim"]
    A_pad = bias.shape[1]

    B = obs.shape[0]
    assert obs.shape[1] == D
    if out_dtype is None:
        out_dtype = obs.dtype

    vmem_cap = _vmem_capacity_bytes()
    big_vmem = vmem_cap >= (100 << 20)           # v5e / v6e (128 MiB) vs v7x (64 MiB)
    slab_cap = (12 << 20) if big_vmem else (4 << 20)
    bmax = 1024 if big_vmem else 512

    if mode == "fused":
        chunk_outer = D
        live_cols = F + 2 * (D ** degree)        # scratch + monomial value + temp
    else:
        prev = D ** (degree - 1)
        chunk_outer = max(1, min(D, 2048 // max(1, prev)))
        live_cols = prev + 3 * chunk_outer * prev + A_pad

    if block_b is None:
        cap = max(8, slab_cap // (4 * max(1, live_cols)))
        B8 = ((B + 7) // 8) * 8
        block_b = max(8, (min(bmax, cap, B8) // 8) * 8)
    # Keep >=2 grid steps when the batch allows it (v7x has 2 TensorCores).
    if ((B + block_b - 1) // block_b) < 2 and block_b >= 256:
        block_b = max(128, ((block_b // 2) // 8) * 8)

    B_pad = ((B + block_b - 1) // block_b) * block_b
    x = obs
    if x.dtype != jnp.float32:
        x = x.astype(jnp.float32)
    if B_pad != B:
        x = jnp.pad(x, ((0, B_pad - B), (0, 0)))   # only when actually needed

    grid = (B_pad // block_b,)
    op_bytes = jnp.dtype(op_dtype).itemsize
    out_bytes = jnp.dtype(out_dtype).itemsize
    w_bytes = sum(int(w.size) for w in weights) * op_bytes

    if mode == "fused":
        kernel = partial(_poly_q_fused_kernel, degree=degree, op_dtype=op_dtype)
        scratch = [pltpu.VMEM((block_b, F), jnp.float32)]
        scratch_bytes = block_b * F * 4
    else:
        kernel = partial(_poly_q_chunked_kernel, degree=degree,
                         chunk_outer=chunk_outer, op_dtype=op_dtype)
        scratch = [pltpu.VMEM((block_b, A_pad), jnp.float32)]
        scratch_bytes = block_b * A_pad * 4

    def run(single_buffer):
        wbuf = 1 if single_buffer else 2
        # Full VMEM budget: pipelined in/out tiles + resident weights/bias +
        # scratch + live feature temporaries (incl. 3-D broadcast temp).
        vmem_bytes = (2 * block_b * D * 4
                      + 2 * block_b * A_pad * out_bytes
                      + wbuf * (w_bytes + 4 * A_pad)
                      + scratch_bytes
                      + 4 * block_b * live_cols)
        ceiling = (100 << 20) if big_vmem else min(48 << 20, (vmem_cap * 3) // 4)
        vmem_limit = int(min(ceiling, max(16 << 20, int(1.3 * vmem_bytes))))

        in_specs = [pl.BlockSpec((block_b, D), lambda i: (i, 0))]
        for w in weights:
            in_specs.append(_resident_spec(w.shape, single_buffer))
        in_specs.append(_resident_spec(bias.shape, single_buffer))

        return pl.pallas_call(
            kernel,
            out_shape=jax.ShapeDtypeStruct((B_pad, A_pad), out_dtype),
            grid=grid,
            in_specs=in_specs,
            out_specs=pl.BlockSpec((block_b, A_pad), lambda i: (i, 0)),
            scratch_shapes=scratch,
            compiler_params=pltpu.CompilerParams(
                dimension_semantics=("parallel",),
                vmem_limit_bytes=vmem_limit),
        )(x, *weights, bias)

    if single_buffer_weights:
        try:
            out = run(True)
        except Exception:
            out = run(False)   # fall back to default double-buffered residents
    else:
        out = run(False)

    return out[:B, :A]


# ----------------------------------------------------------------------------
# Pure-JAX reference (mirrors PyTorch make_features + nn.Linear)
# ----------------------------------------------------------------------------
def _make_features_ref(x, degree):
    feats = []
    a = x
    for n in range(1, degree + 1):
        if n > 1:
            a = (a[:, :, None] * x[:, None, :]).reshape(x.shape[0], -1)
        feats.append(a)
    return jnp.concatenate(feats, axis=1)


if __name__ == "__main__":
    def check(B, D, A, degree, op_dtype, atol, rtol):
        F = sum(D ** n for n in range(1, degree + 1))
        key = jax.random.PRNGKey(0)
        k_obs, k_w, k_b = jax.random.split(key, 3)
        obs = jax.random.normal(k_obs, (B, D), jnp.float32)
        bound = 1.0 / (F ** 0.5)                       # PyTorch-style uniform bound
        w_lin = jax.random.uniform(k_w, (A, F), jnp.float32, -bound, bound)
        b_lin = jax.random.uniform(k_b, (A,), jnp.float32, -bound, bound)

        params = pack_params(w_lin, b_lin, D, degree, op_dtype=op_dtype)
        out = action_value_dis_forward(obs, params)
        out = jax.block_until_ready(out)

        ref = _make_features_ref(obs, degree) @ w_lin.T + b_lin
        assert out.shape == (B, A)
        err = float(jnp.max(jnp.abs(out - ref)))
        assert jnp.allclose(out, ref, atol=atol, rtol=rtol), (params["mode"], err)
        return params["mode"]

    # Small config (fused single-matmul path), exact f32 MXU operands.
    m = check(B=2, D=4, A=5, degree=3, op_dtype=jnp.float32, atol=1e-4, rtol=1e-4)
    assert m == "fused"
    # Same config with bf16 MXU operands (default packing; f32 accumulation).
    m = check(B=2, D=4, A=5, degree=3, op_dtype=jnp.bfloat16, atol=5e-2, rtol=5e-2)
    assert m == "fused"
    # Larger obs_dim exercises the K-chunked top-degree path (F = 4368 > 1024).
    m = check(B=32, D=16, A=5, degree=3, op_dtype=jnp.bfloat16, atol=1e-1, rtol=5e-2)
    assert m == "chunked"

    # TODO(synk): action_distribution_cls handling is policy-side bookkeeping,
    # not part of the forward math, and is intentionally not implemented here.
    print("KERNEL_OK")
</pallas_src>

<mosaic_0001>
module attributes {stable_mosaic.version = 11 : i64} {
  func.func @_poly_q_fused_kernel(%arg0: i32, %arg1: memref<8x4xf32, #tpu.memory_space<vmem>>, %arg2: memref<84x128xf32, #tpu.memory_space<vmem>>, %arg3: memref<1x128xf32, #tpu.memory_space<vmem>>, %arg4: memref<8x128xf32, #tpu.memory_space<vmem>>, %arg5: memref<8x84xf32, #tpu.memory_space<vmem>>) attributes {dimension_semantics = [#tpu.dimension_semantics<parallel>], iteration_bounds = array<i64: 1>, scalar_prefetch = 0 : i64, scratch_operands = 1 : i64, tpu.core_type = #tpu.core_type<tc>, window_params = [{transform_indices = @transform_0, window_bounds = array<i64: 8, 4>}, {pipeline_mode = #tpu.pipeline_mode<synchronous>, transform_indices = @transform_1, window_bounds = array<i64: 84, 128>}, {pipeline_mode = #tpu.pipeline_mode<synchronous>, transform_indices = @transform_2, window_bounds = array<i64: 1, 128>}, {transform_indices = @transform_3, window_bounds = array<i64: 8, 128>}]} {
    %c0 = arith.constant 0 : index
    %c0_0 = arith.constant 0 : index
    %0 = vector.load %arg1[%c0, %c0_0] : memref<8x4xf32, #tpu.memory_space<vmem>>, vector<8x4xf32>
    %c0_1 = arith.constant 0 : index
    %c0_2 = arith.constant 0 : index
    %1 = vector.load %arg5[%c0_1, %c0_2] : memref<8x84xf32, #tpu.memory_space<vmem>>, vector<8x4xf32>
    tpu.vector_store %arg5[%c0_1, %c0_2], %0 {strides = array<i32>} : memref<8x84xf32, #tpu.memory_space<vmem>>, vector<8x4xf32>,
    %2 = vector.shape_cast %0 : vector<8x4xf32> to vector<8x4x1xf32>
    %3 = vector.shape_cast %0 : vector<8x4xf32> to vector<8x1x4xf32>
    %4 = vector.broadcast %2 : vector<8x4x1xf32> to vector<8x4x4xf32>
    %5 = vector.broadcast %3 : vector<8x1x4xf32> to vector<8x4x4xf32>
    %6 = arith.mulf %4, %5 : vector<8x4x4xf32>
    %7 = vector.shape_cast %6 : vector<8x4x4xf32> to vector<8x16xf32>
    %c0_3 = arith.constant 0 : index
    %c4 = arith.constant 4 : index
    %8 = vector.load %arg5[%c0_3, %c4] : memref<8x84xf32, #tpu.memory_space<vmem>>, vector<8x16xf32>
    tpu.vector_store %arg5[%c0_3, %c4], %7 {strides = array<i32>} : memref<8x84xf32, #tpu.memory_space<vmem>>, vector<8x16xf32>,
    %9 = vector.shape_cast %0 : vector<8x4xf32> to vector<8x4x1xf32>
    %10 = vector.shape_cast %7 : vector<8x16xf32> to vector<8x1x16xf32>
    %11 = vector.broadcast %9 : vector<8x4x1xf32> to vector<8x4x16xf32>
    %12 = vector.broadcast %10 : vector<8x1x16xf32> to vector<8x4x16xf32>
    %13 = arith.mulf %11, %12 : vector<8x4x16xf32>
    %14 = vector.shape_cast %13 : vector<8x4x16xf32> to vector<8x64xf32>
    %c0_4 = arith.constant 0 : index
    %c20 = arith.constant 20 : index
    %15 = vector.load %arg5[%c0_4, %c20] : memref<8x84xf32, #tpu.memory_space<vmem>>, vector<8x64xf32>
    tpu.vector_store %arg5[%c0_4, %c20], %14 {strides = array<i32>} : memref<8x84xf32, #tpu.memory_space<vmem>>, vector<8x64xf32>,
    %c0_5 = arith.constant 0 : index
    %c0_6 = arith.constant 0 : index
    %16 = vector.load %arg5[%c0_5, %c0_6] : memref<8x84xf32, #tpu.memory_space<vmem>>, vector<8x84xf32>
    %c0_7 = arith.constant 0 : index
    %c0_8 = arith.constant 0 : index
    %17 = vector.load %arg2[%c0_7, %c0_8] : memref<84x128xf32, #tpu.memory_space<vmem>>, vector<84x128xf32>
    %cst = arith.constant dense<0.000000e+00> : vector<8x128xf32>
    %18 = tpu.matmul %16, %17, %cst {dimension_numbers = #tpu.dot_dimension_numbers<[1], [0], [0], [1], [0, 0, 1, 1], [], []>} : vector<8x84xf32>, vector<84x128xf32>, vector<8x128xf32> -> vector<8x128xf32>
    %c0_9 = arith.constant 0 : index
    %c0_10 = arith.constant 0 : index
    %19 = vector.load %arg3[%c0_9, %c0_10] : memref<1x128xf32, #tpu.memory_space<vmem>>, vector<1x128xf32>
    %20 = vector.broadcast %19 : vector<1x128xf32> to vector<8x128xf32>
    %21 = arith.addf %18, %20 : vector<8x128xf32>
    %c0_11 = arith.constant 0 : index
    %c0_12 = arith.constant 0 : index
    %22 = vector.load %arg4[%c0_11, %c0_12] : memref<8x128xf32, #tpu.memory_space<vmem>>, vector<8x128xf32>
    tpu.vector_store %arg4[%c0_11, %c0_12], %21 {strides = array<i32>} : memref<8x128xf32, #tpu.memory_space<vmem>>, vector<8x128xf32>,
    return
  }
  func.func @transform_0(%arg0: i32) -> (i32, i32) {
    %c0_i32 = arith.constant 0 : i32
    %c0_i32_0 = arith.constant 0 : i32
    return %arg0, %c0_i32 : i32, i32
  }
  func.func @transform_1(%arg0: i32) -> (i32, i32) {
    %c0_i32 = arith.constant 0 : i32
    %c0_i32_0 = arith.constant 0 : i32
    %c0_i32_1 = arith.constant 0 : i32
    return %c0_i32, %c0_i32_0 : i32, i32
  }
  func.func @transform_2(%arg0: i32) -> (i32, i32) {
    %c0_i32 = arith.constant 0 : i32
    %c0_i32_0 = arith.constant 0 : i32
    %c0_i32_1 = arith.constant 0 : i32
    return %c0_i32, %c0_i32_0 : i32, i32
  }
  func.func @transform_3(%arg0: i32) -> (i32, i32) {
    %c0_i32 = arith.constant 0 : i32
    %c0_i32_0 = arith.constant 0 : i32
    return %arg0, %c0_i32 : i32, i32
  }
}

module attributes {stable_mosaic.version = 11 : i64} {
  func.func @_poly_q_fused_kernel(%arg0: i32, %arg1: memref<8x4xf32, #tpu.memory_space<vmem>>, %arg2: memref<84x128xf32, #tpu.memory_space<vmem>>, %arg3: memref<1x128xf32, #tpu.memory_space<vmem>>, %arg4: memref<8x128xf32, #tpu.memory_space<vmem>>, %arg5: memref<8x84xf32, #tpu.memory_space<vmem>>) attributes {dimension_semantics = [#tpu.dimension_semantics<parallel>], iteration_bounds = array<i64: 1>, scalar_prefetch = 0 : i64, scratch_operands = 1 : i64, tpu.core_type = #tpu.core_type<tc>, window_params = [{transform_indices = @transform_0, window_bounds = array<i64: 8, 4>}, {pipeline_mode = #tpu.pipeline_mode<synchronous>, transform_indices = @transform_1, window_bounds = array<i64: 84, 128>}, {pipeline_mode = #tpu.pipeline_mode<synchronous>, transform_indices = @transform_2, window_bounds = array<i64: 1, 128>}, {transform_indices = @transform_3, window_bounds = array<i64: 8, 128>}]} {
    %c0 = arith.constant 0 : index
    %c0_0 = arith.constant 0 : index
    %0 = vector.load %arg1[%c0, %c0_0] : memref<8x4xf32, #tpu.memory_space<vmem>>, vector<8x4xf32>
    %c0_1 = arith.constant 0 : index
    %c0_2 = arith.constant 0 : index
    %1 = vector.load %arg5[%c0_1, %c0_2] : memref<8x84xf32, #tpu.memory_space<vmem>>, vector<8x4xf32>
    tpu.vector_store %arg5[%c0_1, %c0_2], %0 {strides = array<i32>} : memref<8x84xf32, #tpu.memory_space<vmem>>, vector<8x4xf32>,
    %2 = vector.shape_cast %0 : vector<8x4xf32> to vector<8x4x1xf32>
    %3 = vector.shape_cast %0 : vector<8x4xf32> to vector<8x1x4xf32>
    %4 = vector.broadcast %2 : vector<8x4x1xf32> to vector<8x4x4xf32>
    %5 = vector.broadcast %3 : vector<8x1x4xf32> to vector<8x4x4xf32>
    %6 = arith.mulf %4, %5 : vector<8x4x4xf32>
    %7 = vector.shape_cast %6 : vector<8x4x4xf32> to vector<8x16xf32>
    %c0_3 = arith.constant 0 : index
    %c4 = arith.constant 4 : index
    %8 = vector.load %arg5[%c0_3, %c4] : memref<8x84xf32, #tpu.memory_space<vmem>>, vector<8x16xf32>
    tpu.vector_store %arg5[%c0_3, %c4], %7 {strides = array<i32>} : memref<8x84xf32, #tpu.memory_space<vmem>>, vector<8x16xf32>,
    %9 = vector.shape_cast %0 : vector<8x4xf32> to vector<8x4x1xf32>
    %10 = vector.shape_cast %7 : vector<8x16xf32> to vector<8x1x16xf32>
    %11 = vector.broadcast %9 : vector<8x4x1xf32> to vector<8x4x16xf32>
    %12 = vector.broadcast %10 : vector<8x1x16xf32> to vector<8x4x16xf32>
    %13 = arith.mulf %11, %12 : vector<8x4x16xf32>
    %14 = vector.shape_cast %13 : vector<8x4x16xf32> to vector<8x64xf32>
    %c0_4 = arith.constant 0 : index
    %c20 = arith.constant 20 : index
    %15 = vector.load %arg5[%c0_4, %c20] : memref<8x84xf32, #tpu.memory_space<vmem>>, vector<8x64xf32>
    tpu.vector_store %arg5[%c0_4, %c20], %14 {strides = array<i32>} : memref<8x84xf32, #tpu.memory_space<vmem>>, vector<8x64xf32>,
    %c0_5 = arith.constant 0 : index
    %c0_6 = arith.constant 0 : index
    %16 = vector.load %arg5[%c0_5, %c0_6] : memref<8x84xf32, #tpu.memory_space<vmem>>, vector<8x84xf32>
    %c0_7 = arith.constant 0 : index
    %c0_8 = arith.constant 0 : index
    %17 = vector.load %arg2[%c0_7, %c0_8] : memref<84x128xf32, #tpu.memory_space<vmem>>, vector<84x128xf32>
    %cst = arith.constant dense<0.000000e+00> : vector<8x128xf32>
    %18 = tpu.matmul %16, %17, %cst {dimension_numbers = #tpu.dot_dimension_numbers<[1], [0], [0], [1], [0, 0, 1, 1], [], []>} : vector<8x84xf32>, vector<84x128xf32>, vector<8x128xf32> -> vector<8x128xf32>
    %c0_9 = arith.constant 0 : index
    %c0_10 = arith.constant 0 : index
    %19 = vector.load %arg3[%c0_9, %c0_10] : memref<1x128xf32, #tpu.memory_space<vmem>>, vector<1x128xf32>
    %20 = vector.broadcast %19 : vector<1x128xf32> to vector<8x128xf32>
    %21 = arith.addf %18, %20 : vector<8x128xf32>
    %c0_11 = arith.constant 0 : index
    %c0_12 = arith.constant 0 : index
    %22 = vector.load %arg4[%c0_11, %c0_12] : memref<8x128xf32, #tpu.memory_space<vmem>>, vector<8x128xf32>
    tpu.vector_store %arg4[%c0_11, %c0_12], %21 {strides = array<i32>} : memref<8x128xf32, #tpu.memory_space<vmem>>, vector<8x128xf32>,
    return
  }
  func.func @transform_0(%arg0: i32) -> (i32, i32) {
    %c0_i32 = arith.constant 0 : i32
    %c0_i32_0 = arith.constant 0 : i32
    return %arg0, %c0_i32 : i32, i32
  }
  func.func @transform_1(%arg0: i32) -> (i32, i32) {
    %c0_i32 = arith.constant 0 : i32
    %c0_i32_0 = arith.constant 0 : i32
    %c0_i32_1 = arith.constant 0 : i32
    return %c0_i32, %c0_i32_0 : i32, i32
  }
  func.func @transform_2(%arg0: i32) -> (i32, i32) {
    %c0_i32 = arith.constant 0 : i32
    %c0_i32_0 = arith.constant 0 : i32
    %c0_i32_1 = arith.constant 0 : i32
    return %c0_i32, %c0_i32_0 : i32, i32
  }
  func.func @transform_3(%arg0: i32) -> (i32, i32) {
    %c0_i32 = arith.constant 0 : i32
    %c0_i32_0 = arith.constant 0 : i32
    return %arg0, %c0_i32 : i32, i32
  }
}

</mosaic_0001>

<bundles_post_ra>
// kernel: tpu_custom_call.1
= control target key start
LH: loop header
LB: loop body
LE: loop exit
PB: predicated region body
PF: predicated region fallthrough
CT: control target
= control target key end

     0   :  { %8 = vsyncpa [#allocation4], 0  ;;  %s1240_s0 = inlined_call_operand.vmem [shape: f32[8,4], index: 0, kind: input, shape index: {}]   ;;  %s1241_s1 = inlined_call_operand.hbm [shape: f32[84,128], index: 1, kind: input, shape index: {}]   ;;  %s1242_s2 = inlined_call_operand.vmem [shape: f32[1,128], index: 2, kind: input, shape index: {}]   ;;  %s1243_s3 = inlined_call_operand.hbm [shape: f32[8,128], index: 3, kind: output, shape index: {}]  }
   0x1   :  { %9 = vsyncpa [#allocation5], 0  ;;  %s954_s12 = smov [#allocation3]   ;;  %s906_s16 = scalar_lea.hbm %s1241_s1, 1408 }
   0x2   :  { %s17_s13 = sshll.u32 %s954_s12, 4  ;;  %p907_p0 = scmp.ne.s32.totalorder %s1241_s1, %s906_s16  ;;  %s18_s13 = int_to_ptr.vmem [resolvable:$true] %s17_s13 }
   0x3   :  { %p910_p1 = scmp.lt.u32.totalorder %s906_s16, %s1241_s1 }
   0x5   :  { %p912_p2 = pnand %p910_p1, %p907_p0 }
   0x7   :  { %915 = shalt.err (!%p912_p2)
}
   0x8   :  { %s916_s21 = scalar_lea.vmem %s18_s13, 1408  ;;  %p921_p4 = scmp.lt.s32.totalorder %s18_s13, %s18_s13 }
   0x9   :  { %p917_p3 = scmp.ne.s32.totalorder %s18_s13, %s916_s21  ;;  %p922_p5 = scmp.lt.s32.totalorder %s916_s21, %s916_s21 }
   0xb   :  { %p923_p6 = por %p922_p5, %p921_p4 }
   0xd   :  { %p924_p7 = pnand %p923_p6, %p917_p3 }
   0xf   :  { %927 = shalt.err (!%p924_p7)
}
  0x10   :  { %s955_s22 = smov 128   ;;  %s956_s23 = smov 8  }
  0x11   :  { %23 = dma.hbm_to_vmem [thread:$0]  %s1241_s1, 1408, %s18_s13, [#allocation4], %s955_s22, %s955_s22, %s956_s23  }
  0x12   :  { %950 = dma.done.wait [#allocation4], 1408  }
  0x13   :  { %951 = vsyncadd [#allocation4], 4294965888  ;;  %v32_v0 = vlaneseq  ;;  %v957_v2 = vmov 1966171168   ;;  %v29_v9 = vld [vmem:[%s1240_s0] sm:$0xff]  ;;  %vm30_vm0 = vcmask 31744  }
  0x14   :  { %v91_v3 = vunpack.c.l.s4 %v957_v2  ;;  %v89_v17 = vcombine.high %v29_v9, %v29_v9  ;;  %31 = vst.msk [vmem:[#allocation2] sm:$0xff] %vm30_vm0, %v29_v9  ;;  %v958_v32 = vmov 1983009808   ;;  %v959_v34 = vmov 1934713408   ;;  %s961_s0 = smov 4  }
  0x15   :  { %v33_v1 = vshrl.u32 %v32_v0, 7  ;;  %v188_v33 = vunpack.c.l.s4 %v958_v32  ;;  %v221_v35 = vunpack.c.l.s4 %v959_v34  ;;  %v960_v0 = vmov 0.0   ;;  %s962_s1 = smov 12   ;;  %s964_s28 = smov 48  }
  0x16   :  { %v92_v8 = vunpack.c.0.s8 %v91_v3  ;;  %vm267_vm1 = vcmask 64512   ;;  %vm269_vm2 = vcmask 97280   ;;  %s965_s29 = smov 16   ;;  %s966_s30 = smov 32   ;;  %vm967_vm3 = vmmov 0  }
  0x17   :  { %v1003_v4 = vsub.s32 0, %v33_v1  ;;  %v48_v5 = vsub.s32 2, %v33_v1  ;;  %v55_v6 = vsub.s32 3, %v33_v1  ;;  %v41_v7 = vsub.s32 1, %v33_v1  ;;  %871 = vmatprep.mubr.msk.f32.mxu0 %vm967_vm3, %v960_v0  ;;  %s968_s4 = smov 20   ;;  %s969_s7 = smov [#allocation6]  }
  0x18   :  { %v69_v13 = vsub.s32 5, %v33_v1  ;;  %v62_v14 = vsub.s32 4, %v33_v1  ;;  %v95_v16 = vsub.s32 %v92_v8, %v33_v1  ;;  %v83_v22 = vsub.s32 7, %v33_v1  ;;  %s825_s8 = sshll.u32 %s969_s7, 4  ;;  %s826_s8 = int_to_ptr.vmem [resolvable:$true] %s825_s8 }
  0x19   :  { %v49_v10 = vrot.slane %v29_v9, %v48_v5  ;;  %v35_v11 = vrot.slane %v29_v9, %v1003_v4  ;;  %v56_v12 = vrot.slane %v29_v9, %v55_v6  ;;  %v42_v15 = vrot.slane %v29_v9, %v41_v7  ;;  %s928_s9 = scalar_lea.vmem %s826_s8, 128  ;;  %p933_p9 = scmp.lt.s32.totalorder %s826_s8, %s826_s8 }
  0x1a   :  { %v96_v18 = vrot.slane %v29_v9, %v95_v16  ;;  %v103_v19 = vrot.slane %v89_v17, %v95_v16  ;;  %v70_v20 = vrot.slane %v29_v9, %v69_v13  ;;  %v63_v21 = vrot.slane %v29_v9, %v62_v14  ;;  %p929_p8 = scmp.ne.s32.totalorder %s826_s8, %s928_s9  ;;  %p934_p10 = scmp.lt.s32.totalorder %s928_s9, %s928_s9 }
  0x1b   :  { %51 = vbcast.lane.b32.xlu1 %v49_v10, 256  ;;  %37 = vbcast.lane.b32.xlu0 %v35_v11, 256  ;;  %v76_v23 = vsub.s32 6, %v33_v1  ;;  %v84_v30 = vrot.slane %v29_v9, %v83_v22  ;;  %v189_v37 = vunpack.c.0.s8 %v188_v33  ;;  %v222_v38 = vunpack.c.0.s8 %v221_v35 }
  0x1c   :  { %v112_v24 = vrot.slane %v96_v18, %v95_v16  ;;  %v104_v25 = vcombine.high %v96_v18, %v96_v18  ;;  %v105_v26 = vcombine.high %v103_v19, %v103_v19  ;;  %v119_v27 = vrot.slane %v103_v19, %v95_v16  ;;  %p935_p11 = por %p934_p10, %p933_p9 }
  0x1d   :  { %v77_v31 = vrot.slane %v29_v9, %v76_v23  ;;  %v1012_v42 = vsub.s32 %v189_v37, %v33_v1  ;;  %v1018_v45 = vsub.s32 %v222_v38, %v33_v1  ;;  %vm744_vm4 = vcmask 1043456  }
  0x1e   :  { %v126_v28 = vrot.slane %v104_v25, %v95_v16  ;;  %v133_v29 = vrot.slane %v105_v26, %v95_v16  ;;  %v134_v36 = vcombine.high %v112_v24, %v112_v24  ;;  %v141_v40 = vrot.slane %v112_v24, %v1003_v4  ;;  %p936_p12 = pnand %p935_p11, %p929_p8 }
  0x1f   :  { %58 = vbcast.lane.b32.xlu1 %v56_v12, 256  ;;  %44 = vbcast.lane.b32.xlu0 %v42_v15, 256  ;;  %v157_v55 = vrot.slane %v119_v27, %v1003_v4  ;;  %v135_v56 = vcombine.high %v119_v27, %v119_v27  ;;  %vm709_vm5 = vcmask 130048   ;;  %vm711_vm6 = vcmask 261120  }
  0x20   :  { %v149_v39 = vrot.slane %v134_v36, %v1003_v4  ;;  %v136_v41 = vcombine.high %v126_v28, %v126_v28  ;;  %v145_v49 = vrot.slane %v126_v28, %v1003_v4  ;;  %v161_v54 = vrot.slane %v133_v29, %v1003_v4 }
  0x21   :  { %v137_v60 = vcombine.high %v133_v29, %v133_v29  ;;  %v165_v7 = vrot.slane %v135_v56, %v1003_v4  ;;  %vm713_vm7 = vcmask 392192   ;;  %vm275_vm8 = vcmask 162848  }
  0x22   :  { %v153_v48 = vrot.slane %v136_v41, %v1003_v4  ;;  %vm719_vm9 = vcmask 687264   ;;  %vm740_vm10 = vcmask 687104  }
  0x23   :  { %72 = vbcast.lane.b32.xlu1 %v70_v20, 256  ;;  %65 = vbcast.lane.b32.xlu0 %v63_v21, 256  ;;  %v169_v10 = vrot.slane %v137_v60, %v1003_v4 }
  0x27   :  { %86 = vbcast.lane.b32.xlu1 %v84_v30, 256  ;;  %79 = vbcast.lane.b32.xlu0 %v77_v31, 256 }
  0x8d   :  { %v1014_v43 = vpop.permute.xlu1 %51  ;;  %v1016_v44 = vpop.permute.xlu0 %37 }
  0x8e   :  { %v180_v46 = vmul.f32 %v149_v39, %v1014_v43  ;;  %v178_v47 = vmul.f32 %v141_v40, %v1016_v44 }
  0x90   :  { %v1025_v50 = vrot.slane %v180_v46, %v1012_v42  ;;  %v283_v51 = vrot.slane %v178_v47, %v1012_v42  ;;  %v186_v61 = vcombine.low %v178_v47, %v180_v46 }
  0x91   :  { %v1028_v52 = vpop.permute.xlu1 %58  ;;  %v1030_v53 = vpop.permute.xlu0 %44 }
  0x92   :  { %v1036_v57 = vrot.slane %v1025_v50, %v1018_v45  ;;  %v1039_v58 = vrot.slane %v283_v51, %v1018_v45  ;;  %v181_v59 = vmul.f32 %v153_v48, %v1028_v52  ;;  %v179_v62 = vmul.f32 %v145_v49, %v1030_v53 }
  0x93   :  { %v193_v12 = vrot.slane %v186_v61, %v1012_v42  ;;  %v284_v39 = vcombine.high %v283_v51, %v960_v0  ;;  %v332_v51 = vcombine.high %v1025_v50, %v960_v0 }
  0x94   :  { %v1044_v63 = vrot.slane %v181_v59, %v1012_v42  ;;  %v299_v1 = vcombine.high %v1039_v58, %v960_v0  ;;  %v194_v2 = vcombine.low %v179_v62, %v181_v59  ;;  %v307_v3 = vrot.slane %v179_v62, %v1012_v42 }
  0x95   :  { %v1049_v5 = vpop.permute.xlu1 %72  ;;  %v1051_v6 = vpop.permute.xlu0 %65  ;;  %v347_v11 = vcombine.high %v1036_v57, %v960_v0  ;;  %v298_v59 = vrot.slane %v284_v39, %v1018_v45  ;;  %v346_v50 = vrot.slane %v332_v51, %v1018_v45 }
  0x96   :  { %v183_v8 = vmul.f32 %v161_v54, %v1049_v5  ;;  %v182_v9 = vmul.f32 %v157_v55, %v1051_v6  ;;  %477 = vrot.lane.b32.xlu0 %v299_v1, %s961_s0  ;;  %v1063_v13 = vrot.slane %v1044_v63, %v1018_v45  ;;  %v201_v14 = vrot.slane %v194_v2, %v1012_v42 }
  0x97   :  { %v1067_v15 = vrot.slane %v307_v3, %v1018_v45  ;;  %v308_v60 = vcombine.high %v307_v3, %v960_v0  ;;  %v356_v2 = vcombine.high %v1044_v63, %v960_v0 }
  0x98   :  { %v403_v16 = vrot.slane %v183_v8, %v1012_v42  ;;  %v379_v17 = vrot.slane %v182_v9, %v1012_v42  ;;  %v218_v18 = vcombine.low %v193_v12, %v201_v14  ;;  %v371_v26 = vcombine.high %v1063_v13, %v960_v0 }
  0x99   :  { %v1071_v19 = vpop.permute.xlu1 %86  ;;  %v1073_v20 = vpop.permute.xlu0 %79  ;;  %v323_v21 = vcombine.high %v1067_v15, %v960_v0  ;;  %v219_v40 = vcombine.high %v193_v12, %v201_v14  ;;  %v322_v1 = vrot.slane %v308_v60, %v1018_v45  ;;  %v370_v3 = vrot.slane %v356_v2, %v1018_v45 }
  0x9a   :  { %v1078_v22 = vrot.slane %v379_v17, %v1018_v45  ;;  %v185_v23 = vmul.f32 %v169_v10, %v1071_v19  ;;  %v184_v24 = vmul.f32 %v165_v7, %v1073_v20  ;;  %481 = vrot.lane.b32.xlu0 %v347_v11, %s961_s0  ;;  %v1084_v25 = vrot.slane %v403_v16, %v1018_v45 }
  0x9b   :  { %479 = vrot.lane.b32.xlu1 %v323_v21, %s961_s0  ;;  %v1109_v46 = vrot.slane %v218_v18, %v1018_v45  ;;  %v233_v49 = vrot.slane %v219_v40, %v1018_v45  ;;  %v380_v7 = vcombine.high %v379_v17, %v960_v0  ;;  %v300_v14 = vcombine.high %v298_v59, %v960_v0 }
  0x9c   :  { %v210_v27 = vcombine.low %v183_v8, %v185_v23  ;;  %v451_v28 = vrot.slane %v185_v23, %v1012_v42  ;;  %v202_v29 = vcombine.low %v182_v9, %v184_v24  ;;  %v427_v30 = vrot.slane %v184_v24, %v1012_v42 }
  0x9d   :  { %v395_v31 = vcombine.high %v1078_v22, %v960_v0  ;;  %v419_v36 = vcombine.high %v1084_v25, %v960_v0  ;;  %v394_v8 = vrot.slane %v380_v7, %v1018_v45  ;;  %v404_v9 = vcombine.high %v403_v16, %v960_v0 }
  0x9e   :  { %v217_v32 = vrot.slane %v210_v27, %v1012_v42  ;;  %v209_v33 = vrot.slane %v202_v29, %v1012_v42  ;;  %v1096_v34 = vrot.slane %v427_v30, %v1018_v45  ;;  %v1099_v35 = vrot.slane %v451_v28, %v1018_v45 }
  0x9f   :  { %483 = vrot.lane.b32.xlu1 %v371_v26, %s961_s0  ;;  %485 = vrot.lane.b32.xlu0 %v395_v31, %s961_s0  ;;  %v428_v10 = vcombine.high %v427_v30, %v960_v0  ;;  %v418_v63 = vrot.slane %v404_v9, %v1018_v45  ;;  %v452_v12 = vcombine.high %v451_v28, %v960_v0 }
  0xa0   :  { %v234_v37 = vcombine.low %v209_v33, %v217_v32  ;;  %v443_v38 = vcombine.high %v1096_v34, %v960_v0  ;;  %v235_v41 = vcombine.high %v209_v33, %v217_v32  ;;  %v467_v48 = vcombine.high %v1099_v35, %v960_v0 }
  0xa1   :  { %v442_v11 = vrot.slane %v428_v10, %v1018_v45  ;;  %v466_v16 = vrot.slane %v452_v12, %v1018_v45  ;;  %v324_v17 = vcombine.high %v322_v1, %v960_v0  ;;  %v348_v18 = vcombine.high %v346_v50, %v960_v0 }
  0xa2   :  { %v1112_v47 = vrot.slane %v234_v37, %v1018_v45  ;;  %v249_v54 = vrot.slane %v235_v41, %v1018_v45  ;;  %v372_v21 = vcombine.high %v370_v3, %v960_v0  ;;  %v396_v23 = vcombine.high %v394_v8, %v960_v0 }
  0xa3   :  { %487 = vrot.lane.b32.xlu1 %v419_v36, %s961_s0  ;;  %489 = vrot.lane.b32.xlu0 %v443_v38, %s961_s0  ;;  %v420_v24 = vcombine.high %v418_v63, %v960_v0  ;;  %v444_v26 = vcombine.high %v442_v11, %v960_v0  ;;  %v468_v27 = vcombine.high %v466_v16, %v960_v0 }
  0xa4   :  { %v251_v55 = vcombine.high %v1109_v46, %v1112_v47  ;;  %v250_v56 = vcombine.low %v1109_v46, %v1112_v47  ;;  %v252_v61 = vcombine.low %v233_v49, %v249_v54  ;;  %v253_v62 = vcombine.high %v233_v49, %v249_v54  ;;  %v732_v46 = vld [vmem:[#allocation3 + $0x50] sm:$0xf] }
  0xa7   :  { %491 = vrot.lane.b32.xlu1 %v467_v48, %s961_s0  ;;  %509 = vrot.lane.b32.xlu0 %v298_v59, %s956_s23 }
  0xab   :  { %511 = vrot.lane.b32.xlu1 %v322_v1, %s956_s23  ;;  %513 = vrot.lane.b32.xlu0 %v346_v50, %s956_s23 }
  0xaf   :  { %515 = vrot.lane.b32.xlu1 %v370_v3, %s956_s23  ;;  %517 = vrot.lane.b32.xlu0 %v394_v8, %s956_s23 }
  0xb3   :  { %519 = vrot.lane.b32.xlu1 %v418_v63, %s956_s23  ;;  %521 = vrot.lane.b32.xlu0 %v442_v11, %s956_s23 }
  0xb7   :  { %523 = vrot.lane.b32.xlu1 %v466_v16, %s956_s23  ;;  %541 = vrot.lane.b32.xlu0 %v300_v14, %s962_s1 }
  0xbb   :  { %543 = vrot.lane.b32.xlu1 %v324_v17, %s962_s1  ;;  %545 = vrot.lane.b32.xlu0 %v348_v18, %s962_s1 }
  0xbf   :  { %547 = vrot.lane.b32.xlu1 %v372_v21, %s962_s1  ;;  %549 = vrot.lane.b32.xlu0 %v396_v23, %s962_s1 }
  0xc3   :  { %551 = vrot.lane.b32.xlu1 %v420_v24, %s962_s1  ;;  %553 = vrot.lane.b32.xlu0 %v444_v26, %s962_s1 }
  0xc7   :  { %555 = vrot.lane.b32.xlu1 %v468_v27, %s962_s1  ;;  %255 = vrot.lane.b32.xlu0 %v251_v55, %s961_s0 }
  0xcb   :  { %259 = vrot.lane.b32.xlu1 %v252_v61, %s956_s23 }
  0xcf   :  { %263 = vrot.lane.b32.xlu1 %v253_v62, %s962_s1 }
 0x108   :  { %v478_v28 = vpop.permute.xlu0 %477 }
 0x109   :  { %v565_v2 = vsel %vm30_vm0, %v1039_v58, %v478_v28 }
 0x10c   :  { %v482_v29 = vpop.permute.xlu0 %481 }
 0x10d   :  { %v480_v30 = vpop.permute.xlu1 %479  ;;  %v567_v60 = vsel %vm30_vm0, %v1036_v57, %v482_v29 }
 0x10e   :  { %v566_v59 = vsel %vm30_vm0, %v1067_v15, %v480_v30 }
 0x111   :  { %v484_v31 = vpop.permute.xlu1 %483  ;;  %v486_v32 = vpop.permute.xlu0 %485 }
 0x112   :  { %v568_v15 = vsel %vm30_vm0, %v1063_v13, %v484_v31  ;;  %v569_v11 = vsel %vm30_vm0, %v1078_v22, %v486_v32 }
 0x115   :  { %v488_v33 = vpop.permute.xlu1 %487  ;;  %v490_v36 = vpop.permute.xlu0 %489 }
 0x116   :  { %v570_v17 = vsel %vm30_vm0, %v1084_v25, %v488_v33  ;;  %v571_v18 = vsel %vm30_vm0, %v1096_v34, %v490_v36 }
 0x119   :  { %v492_v37 = vpop.permute.xlu1 %491  ;;  %v510_v38 = vpop.permute.xlu0 %509 }
 0x11a   :  { %v573_v57 = vsel %vm267_vm1, %v565_v2, %v510_v38  ;;  %v572_v33 = vsel %vm30_vm0, %v1099_v35, %v492_v37  ;;  %v724_v2 = vld [vmem:[#allocation3 + $0x10] sm:$0xff] }
 0x11d   :  { %v512_v39 = vpop.permute.xlu1 %511  ;;  %v514_v40 = vpop.permute.xlu0 %513 }
 0x11e   :  { %v574_v1 = vsel %vm267_vm1, %v566_v59, %v512_v39  ;;  %v575_v50 = vsel %vm267_vm1, %v567_v60, %v514_v40 }
 0x121   :  { %v516_v41 = vpop.permute.xlu1 %515  ;;  %v518_v48 = vpop.permute.xlu0 %517 }
 0x122   :  { %v576_v8 = vsel %vm267_vm1, %v568_v15, %v516_v41  ;;  %v577_v16 = vsel %vm267_vm1, %v569_v11, %v518_v48  ;;  %v726_v11 = vld [vmem:[#allocation3 + $0x20] sm:$0xff] }
 0x125   :  { %v520_v49 = vpop.permute.xlu1 %519  ;;  %v522_v54 = vpop.permute.xlu0 %521 }
 0x126   :  { %v578_v23 = vsel %vm267_vm1, %v570_v17, %v520_v49  ;;  %v579_v24 = vsel %vm267_vm1, %v571_v18, %v522_v54 }
 0x129   :  { %v524_v51 = vpop.permute.xlu1 %523  ;;  %v542_v55 = vpop.permute.xlu0 %541 }
 0x12a   :  { %v581_v9 = vsel %vm269_vm2, %v573_v57, %v542_v55  ;;  %v580_v38 = vsel %vm267_vm1, %v572_v33, %v524_v51  ;;  %v725_v57 = vld [vmem:[#allocation3 + $0x18] sm:$0xff] }
 0x12b   :  { %v592_v21 = vrot.slane %v581_v9, %v1003_v4 }
 0x12d   :  { %v544_v61 = vpop.permute.xlu1 %543  ;;  %v546_v62 = vpop.permute.xlu0 %545  ;;  %v621_v36 = vmul.f32 %v592_v21, %v1016_v44 }
 0x12e   :  { %v582_v7 = vsel %vm269_vm2, %v574_v1, %v544_v61  ;;  %v583_v3 = vsel %vm269_vm2, %v575_v50, %v546_v62  ;;  %v722_v1 = vld [vmem:[#allocation3] sm:$0xff]  ;;  %v723_v50 = vld [vmem:[#allocation3 + $0x8] sm:$0xff] }
 0x12f   :  { %v596_v58 = vrot.slane %v582_v7, %v1003_v4  ;;  %v600_v12 = vrot.slane %v583_v3, %v1003_v4  ;;  %v963_v3 = vmov 0.0|0.0   ;;  %v875_v15 = vpack.c.bf16 %v723_v50, %v722_v1 }
 0x130   :  { %874 = vmatprep.subr.bf16.mxu0 %v963_v3 }
 0x131   :  { %v548_v10 = vpop.permute.xlu1 %547  ;;  %v550_v63 = vpop.permute.xlu0 %549  ;;  %v622_v29 = vmul.f32 %v596_v58, %v1030_v53  ;;  %v623_v30 = vmul.f32 %v600_v12, %v1014_v43  ;;  %876 = vmatpush3.bf16.msra.mxu0 %v875_v15  ;;  %v727_v58 = vld [vmem:[#allocation3 + $0x28] sm:$0xff] }
 0x132   :  { %v584_v14 = vsel %vm269_vm2, %v576_v8, %v548_v10  ;;  %v585_v22 = vsel %vm269_vm2, %v577_v16, %v550_v63  ;;  %v878_v63 = vpack.c.bf16 %v725_v57, %v724_v2  ;;  %877 = vmatprep.subr.bf16.mxu0 %v963_v3  ;;  %v728_v16 = vld [vmem:[#allocation3 + $0x30] sm:$0xff] }
 0x133   :  { %v604_v13 = vrot.slane %v584_v14, %v1003_v4  ;;  %v608_v31 = vrot.slane %v585_v22, %v1003_v4  ;;  %v629_v40 = vcombine.low %v621_v36, %v623_v30 }
 0x135   :  { %v624_v26 = vmul.f32 %v604_v13, %v1028_v52  ;;  %v552_v27 = vpop.permute.xlu1 %551  ;;  %v554_v28 = vpop.permute.xlu0 %553  ;;  %v625_v48 = vmul.f32 %v608_v31, %v1051_v6  ;;  %v636_v51 = vrot.slane %v629_v40, %v1012_v42  ;;  %879 = vmatpush3.bf16.msra.mxu0 %v878_v63  ;;  %v729_v13 = vld [vmem:[#allocation3 + $0x38] sm:$0xff] }
 0x136   :  { %v586_v25 = vsel %vm269_vm2, %v578_v23, %v552_v27  ;;  %v587_v34 = vsel %vm269_vm2, %v579_v24, %v554_v28  ;;  %880 = vmatprep.subr.bf16.mxu0 %v963_v3  ;;  %v884_v22 = vpack.c.bf16 %v729_v13, %v728_v16  ;;  %v730_v24 = vld [vmem:[#allocation3 + $0x40] sm:$0xff] }
 0x137   :  { %v616_v32 = vrot.slane %v587_v34, %v1003_v4  ;;  %v637_v52 = vcombine.low %v622_v29, %v624_v26  ;;  %v612_v53 = vrot.slane %v586_v25, %v1003_v4  ;;  %v731_v26 = vld [vmem:[#allocation3 + $0x48] sm:$0xff] }
 0x138   :  { %v887_v27 = vpack.c.bf16 %v731_v26, %v730_v24 }
 0x139   :  { %v627_v43 = vmul.f32 %v616_v32, %v1073_v20  ;;  %v556_v39 = vpop.permute.xlu1 %555  ;;  %v644_v54 = vrot.slane %v637_v52, %v1012_v42  ;;  %v626_v35 = vmul.f32 %v612_v53, %v1049_v5  ;;  %v256_v12 = vpop.permute.xlu0 %255  ;;  %v834_v32 = vld [vmem:[%s1242_s2] ss:$0 sm:$0xff] }
 0x13a   :  { %v588_v41 = vsel %vm269_vm2, %v580_v38, %v556_v39  ;;  %v266_v18 = vsel %vm30_vm0, %v250_v56, %v256_v12 }
 0x13b   :  { %v620_v49 = vrot.slane %v588_v41, %v1003_v4  ;;  %v645_v44 = vcombine.low %v625_v48, %v627_v43  ;;  %v662_v59 = vcombine.high %v636_v51, %v644_v54  ;;  %v661_v61 = vcombine.low %v636_v51, %v644_v54 }
 0x13d   :  { %v628_v37 = vmul.f32 %v620_v49, %v1071_v19  ;;  %v652_v20 = vrot.slane %v645_v44, %v1012_v42  ;;  %v676_v4 = vrot.slane %v662_v59, %v1018_v45  ;;  %v669_v19 = vrot.slane %v661_v61, %v1018_v45  ;;  %v260_v8 = vpop.permute.xlu1 %259 }
 0x13e   :  { %v268_v21 = vsel %vm267_vm1, %v266_v18, %v260_v8 }
 0x13f   :  { %v653_v55 = vcombine.low %v626_v35, %v628_v37 }
 0x141   :  { %v660_v60 = vrot.slane %v653_v55, %v1012_v42  ;;  %v264_v17 = vpop.permute.xlu1 %263 }
 0x142   :  { %v270_v23 = vsel %vm269_vm2, %v268_v21, %v264_v17 }
 0x143   :  { %v678_v62 = vcombine.high %v652_v20, %v660_v60  ;;  %v677_v6 = vcombine.low %v652_v20, %v660_v60 }
 0x145   :  { %v692_v5 = vrot.slane %v678_v62, %v1018_v45  ;;  %v685_v7 = vrot.slane %v677_v6, %v1018_v45  ;;  %v881_v45 = vpack.c.bf16 %v727_v58, %v726_v11 }
 0x147   :  { %v696_v42 = vcombine.high %v676_v4, %v692_v5  ;;  %v694_v9 = vcombine.high %v669_v19, %v685_v7  ;;  %v693_v10 = vcombine.low %v669_v19, %v685_v7  ;;  %v695_v14 = vcombine.low %v676_v4, %v692_v5  ;;  %882 = vmatpush3.bf16.msra.mxu0 %v881_v45 }
 0x148   :  { %883 = vmatprep.subr.bf16.mxu0 %v963_v3 }
 0x149   :  { %706 = vrot.lane.b32.xlu1 %v696_v42, %s964_s28  ;;  %698 = vrot.lane.b32.xlu0 %v694_v9, %s965_s29 }
 0x14b   :  { %885 = vmatpush3.bf16.msra.mxu0 %v884_v22 }
 0x14c   :  { %886 = vmatprep.subr.bf16.mxu0 %v963_v3 }
 0x14d   :  { %702 = vrot.lane.b32.xlu0 %v695_v14, %s966_s30 }
 0x14f   :  { %888 = vmatpush3.bf16.msra.mxu0 %v887_v27 }
 0x150   :  { %869 = vmatprep.subr.mxu0 %v960_v0 }
 0x151   :  { %272 = vrot.lane.b32.xlu0 %v270_v23, %s961_s0 }
 0x153   :  { %870 = vmatpush3.msk.msra.mxu0 %vm744_vm4, %v732_v46 }
 0x1bb   :  { %v699_v47 = vpop.permute.xlu0 %698  ;;  %v707_v29 = vpop.permute.xlu1 %706 }
 0x1bc   :  { %v710_v56 = vsel %vm709_vm5, %v693_v10, %v699_v47 }
 0x1bf   :  { %v703_v28 = vpop.permute.xlu0 %702 }
 0x1c0   :  { %v712_v30 = vsel %vm711_vm6, %v710_v56, %v703_v28 }
 0x1c1   :  { %v714_v25 = vsel %vm713_vm7, %v712_v30, %v707_v29 }
 0x1c2   :  { %716 = vrot.lane.b32.xlu1 %v714_v25, %s968_s4 }
 0x1c3   :  { %v273_v34 = vpop.permute.xlu0 %272 }
 0x1c4   :  { %276 = vst.msk [vmem:[#allocation2] sm:$0xff] %vm275_vm8, %v273_v34 }
 0x234   :  { %v717_v31 = vpop.permute.xlu1 %716 }
 0x235   :  { %720 = vst.msk [vmem:[#allocation2] sm:$0xff] %vm719_vm9, %v717_v31 }
 0x23c   :  { %v721_v0 = vld [vmem:[#allocation2] sm:$0xff] }
 0x23d   :  { %872 = vmatmul.mubr.msk.f32.vlgmr.msra.gmra.mrb[0].mxu0 %vm740_vm10, %v721_v0 }
 0x310   :  { %v814_v33 = vpop.f32.mrb[0].mxu0 }
 0x311   :  { %v815_v36 = vadd.f32 %v834_v32, %v814_v33  ;;  %v873_v52 = vpop.f32.mrb[1].mxu0 }
 0x313   :  { %818 = vst [vmem:[#allocation6] sm:$0xff] %v815_v36 }
 0x314   :  { %939 = shalt.err (!%p936_p12)
}
 0x315   :  { %s940_s12 = scalar_lea.hbm %s1243_s3, 128 }
 0x316   :  { %p941_p13 = scmp.ne.s32.totalorder %s1243_s3, %s940_s12  ;;  %p944_p0 = scmp.lt.u32.totalorder %s940_s12, %s1243_s3 }
 0x318   :  { %p946_p1 = pnand %p944_p0, %p941_p13 }
 0x31a   :  { %949 = shalt.err (!%p946_p1)
}
 0x31b   :  { %828 = dma.vmem_to_hbm [thread:$0]  %s826_s8, 128, %s1243_s3, [#allocation5]  }
 0x31c   :  { %952 = dma.done.wait [#allocation5], 128  }
 0x31d   :  { %953 = vsyncadd [#allocation5], 4294967168 }
 0x31e   :  { %832 = vsyncpa [#allocation4], 1 }
 0x31f   :  { %833 = vsyncpa [#allocation5], 1 }

// kernel: tpu_custom_call.1
= control target key start
LH: loop header
LB: loop body
LE: loop exit
PB: predicated region body
PF: predicated region fallthrough
CT: control target
= control target key end

     0   :  { %8 = vsyncpa [#allocation4], 0  ;;  %s1240_s0 = inlined_call_operand.vmem [shape: f32[8,4], index: 0, kind: input, shape index: {}]   ;;  %s1241_s1 = inlined_call_operand.hbm [shape: f32[84,128], index: 1, kind: input, shape index: {}]   ;;  %s1242_s2 = inlined_call_operand.vmem [shape: f32[1,128], index: 2, kind: input, shape index: {}]   ;;  %s1243_s3 = inlined_call_operand.hbm [shape: f32[8,128], index: 3, kind: output, shape index: {}]  }
   0x1   :  { %9 = vsyncpa [#allocation5], 0  ;;  %s954_s12 = smov [#allocation3]   ;;  %s906_s16 = scalar_lea.hbm %s1241_s1, 1408 }
   0x2   :  { %s17_s13 = sshll.u32 %s954_s12, 4  ;;  %p907_p0 = scmp.ne.s32.totalorder %s1241_s1, %s906_s16  ;;  %s18_s13 = int_to_ptr.vmem [resolvable:$true] %s17_s13 }
   0x3   :  { %p910_p1 = scmp.lt.u32.totalorder %s906_s16, %s1241_s1 }
   0x5   :  { %p912_p2 = pnand %p910_p1, %p907_p0 }
   0x7   :  { %915 = shalt.err (!%p912_p2)
}
   0x8   :  { %s916_s21 = scalar_lea.vmem %s18_s13, 1408  ;;  %p921_p4 = scmp.lt.s32.totalorder %s18_s13, %s18_s13 }
   0x9   :  { %p917_p3 = scmp.ne.s32.totalorder %s18_s13, %s916_s21  ;;  %p922_p5 = scmp.lt.s32.totalorder %s916_s21, %s916_s21 }
   0xb   :  { %p923_p6 = por %p922_p5, %p921_p4 }
   0xd   :  { %p924_p7 = pnand %p923_p6, %p917_p3 }
   0xf   :  { %927 = shalt.err (!%p924_p7)
}
  0x10   :  { %s955_s22 = smov 128   ;;  %s956_s23 = smov 8  }
  0x11   :  { %23 = dma.hbm_to_vmem [thread:$0]  %s1241_s1, 1408, %s18_s13, [#allocation4], %s955_s22, %s955_s22, %s956_s23  }
  0x12   :  { %950 = dma.done.wait [#allocation4], 1408  }
  0x13   :  { %951 = vsyncadd [#allocation4], 4294965888  ;;  %v32_v0 = vlaneseq  ;;  %v957_v2 = vmov 1966171168   ;;  %v29_v9 = vld [vmem:[%s1240_s0] sm:$0xff]  ;;  %vm30_vm0 = vcmask 31744  }
  0x14   :  { %v91_v3 = vunpack.c.l.s4 %v957_v2  ;;  %v89_v17 = vcombine.high %v29_v9, %v29_v9  ;;  %31 = vst.msk [vmem:[#allocation2] sm:$0xff] %vm30_vm0, %v29_v9  ;;  %v958_v32 = vmov 1983009808   ;;  %v959_v34 = vmov 1934713408   ;;  %s961_s0 = smov 4  }
  0x15   :  { %v33_v1 = vshrl.u32 %v32_v0, 7  ;;  %v188_v33 = vunpack.c.l.s4 %v958_v32  ;;  %v221_v35 = vunpack.c.l.s4 %v959_v34  ;;  %v960_v0 = vmov 0.0   ;;  %s962_s1 = smov 12   ;;  %s964_s28 = smov 48  }
  0x16   :  { %v92_v8 = vunpack.c.0.s8 %v91_v3  ;;  %vm267_vm1 = vcmask 64512   ;;  %vm269_vm2 = vcmask 97280   ;;  %s965_s29 = smov 16   ;;  %s966_s30 = smov 32   ;;  %vm967_vm3 = vmmov 0  }
  0x17   :  { %v1003_v4 = vsub.s32 0, %v33_v1  ;;  %v48_v5 = vsub.s32 2, %v33_v1  ;;  %v55_v6 = vsub.s32 3, %v33_v1  ;;  %v41_v7 = vsub.s32 1, %v33_v1  ;;  %871 = vmatprep.mubr.msk.f32.mxu0 %vm967_vm3, %v960_v0  ;;  %s968_s4 = smov 20   ;;  %s969_s7 = smov [#allocation6]  }
  0x18   :  { %v69_v13 = vsub.s32 5, %v33_v1  ;;  %v62_v14 = vsub.s32 4, %v33_v1  ;;  %v95_v16 = vsub.s32 %v92_v8, %v33_v1  ;;  %v83_v22 = vsub.s32 7, %v33_v1  ;;  %s825_s8 = sshll.u32 %s969_s7, 4  ;;  %s826_s8 = int_to_ptr.vmem [resolvable:$true] %s825_s8 }
  0x19   :  { %v49_v10 = vrot.slane %v29_v9, %v48_v5  ;;  %v35_v11 = vrot.slane %v29_v9, %v1003_v4  ;;  %v56_v12 = vrot.slane %v29_v9, %v55_v6  ;;  %v42_v15 = vrot.slane %v29_v9, %v41_v7  ;;  %s928_s9 = scalar_lea.vmem %s826_s8, 128  ;;  %p933_p9 = scmp.lt.s32.totalorder %s826_s8, %s826_s8 }
  0x1a   :  { %v96_v18 = vrot.slane %v29_v9, %v95_v16  ;;  %v103_v19 = vrot.slane %v89_v17, %v95_v16  ;;  %v70_v20 = vrot.slane %v29_v9, %v69_v13  ;;  %v63_v21 = vrot.slane %v29_v9, %v62_v14  ;;  %p929_p8 = scmp.ne.s32.totalorder %s826_s8, %s928_s9  ;;  %p934_p10 = scmp.lt.s32.totalorder %s928_s9, %s928_s9 }
  0x1b   :  { %51 = vbcast.lane.b32.xlu1 %v49_v10, 256  ;;  %37 = vbcast.lane.b32.xlu0 %v35_v11, 256  ;;  %v76_v23 = vsub.s32 6, %v33_v1  ;;  %v84_v30 = vrot.slane %v29_v9, %v83_v22  ;;  %v189_v37 = vunpack.c.0.s8 %v188_v33  ;;  %v222_v38 = vunpack.c.0.s8 %v221_v35 }
  0x1c   :  { %v112_v24 = vrot.slane %v96_v18, %v95_v16  ;;  %v104_v25 = vcombine.high %v96_v18, %v96_v18  ;;  %v105_v26 = vcombine.high %v103_v19, %v103_v19  ;;  %v119_v27 = vrot.slane %v103_v19, %v95_v16  ;;  %p935_p11 = por %p934_p10, %p933_p9 }
  0x1d   :  { %v77_v31 = vrot.slane %v29_v9, %v76_v23  ;;  %v1012_v42 = vsub.s32 %v189_v37, %v33_v1  ;;  %v1018_v45 = vsub.s32 %v222_v38, %v33_v1  ;;  %vm744_vm4 = vcmask 1043456  }
  0x1e   :  { %v126_v28 = vrot.slane %v104_v25, %v95_v16  ;;  %v133_v29 = vrot.slane %v105_v26, %v95_v16  ;;  %v134_v36 = vcombine.high %v112_v24, %v112_v24  ;;  %v141_v40 = vrot.slane %v112_v24, %v1003_v4  ;;  %p936_p12 = pnand %p935_p11, %p929_p8 }
  0x1f   :  { %58 = vbcast.lane.b32.xlu1 %v56_v12, 256  ;;  %44 = vbcast.lane.b32.xlu0 %v42_v15, 256  ;;  %v157_v55 = vrot.slane %v119_v27, %v1003_v4  ;;  %v135_v56 = vcombine.high %v119_v27, %v119_v27  ;;  %vm709_vm5 = vcmask 130048   ;;  %vm711_vm6 = vcmask 261120  }
  0x20   :  { %v149_v39 = vrot.slane %v134_v36, %v1003_v4  ;;  %v136_v41 = vcombine.high %v126_v28, %v126_v28  ;;  %v145_v49 = vrot.slane %v126_v28, %v1003_v4  ;;  %v161_v54 = vrot.slane %v133_v29, %v1003_v4 }
  0x21   :  { %v137_v60 = vcombine.high %v133_v29, %v133_v29  ;;  %v165_v7 = vrot.slane %v135_v56, %v1003_v4  ;;  %vm713_vm7 = vcmask 392192   ;;  %vm275_vm8 = vcmask 162848  }
  0x22   :  { %v153_v48 = vrot.slane %v136_v41, %v1003_v4  ;;  %vm719_vm9 = vcmask 687264   ;;  %vm740_vm10 = vcmask 687104  }
  0x23   :  { %72 = vbcast.lane.b32.xlu1 %v70_v20, 256  ;;  %65 = vbcast.lane.b32.xlu0 %v63_v21, 256  ;;  %v169_v10 = vrot.slane %v137_v60, %v1003_v4 }
  0x27   :  { %86 = vbcast.lane.b32.xlu1 %v84_v30, 256  ;;  %79 = vbcast.lane.b32.xlu0 %v77_v31, 256 }
  0x8d   :  { %v1014_v43 = vpop.permute.xlu1 %51  ;;  %v1016_v44 = vpop.permute.xlu0 %37 }
  0x8e   :  { %v180_v46 = vmul.f32 %v149_v39, %v1014_v43  ;;  %v178_v47 = vmul.f32 %v141_v40, %v1016_v44 }
  0x90   :  { %v1025_v50 = vrot.slane %v180_v46, %v1012_v42  ;;  %v283_v51 = vrot.slane %v178_v47, %v1012_v42  ;;  %v186_v61 = vcombine.low %v178_v47, %v180_v46 }
  0x91   :  { %v1028_v52 = vpop.permute.xlu1 %58  ;;  %v1030_v53 = vpop.permute.xlu0 %44 }
  0x92   :  { %v1036_v57 = vrot.slane %v1025_v50, %v1018_v45  ;;  %v1039_v58 = vrot.slane %v283_v51, %v1018_v45  ;;  %v181_v59 = vmul.f32 %v153_v48, %v1028_v52  ;;  %v179_v62 = vmul.f32 %v145_v49, %v1030_v53 }
  0x93   :  { %v193_v12 = vrot.slane %v186_v61, %v1012_v42  ;;  %v284_v39 = vcombine.high %v283_v51, %v960_v0  ;;  %v332_v51 = vcombine.high %v1025_v50, %v960_v0 }
  0x94   :  { %v1044_v63 = vrot.slane %v181_v59, %v1012_v42  ;;  %v299_v1 = vcombine.high %v1039_v58, %v960_v0  ;;  %v194_v2 = vcombine.low %v179_v62, %v181_v59  ;;  %v307_v3 = vrot.slane %v179_v62, %v1012_v42 }
  0x95   :  { %v1049_v5 = vpop.permute.xlu1 %72  ;;  %v1051_v6 = vpop.permute.xlu0 %65  ;;  %v347_v11 = vcombine.high %v1036_v57, %v960_v0  ;;  %v298_v59 = vrot.slane %v284_v39, %v1018_v45  ;;  %v346_v50 = vrot.slane %v332_v51, %v1018_v45 }
  0x96   :  { %v183_v8 = vmul.f32 %v161_v54, %v1049_v5  ;;  %v182_v9 = vmul.f32 %v157_v55, %v1051_v6  ;;  %477 = vrot.lane.b32.xlu0 %v299_v1, %s961_s0  ;;  %v1063_v13 = vrot.slane %v1044_v63, %v1018_v45  ;;  %v201_v14 = vrot.slane %v194_v2, %v1012_v42 }
  0x97   :  { %v1067_v15 = vrot.slane %v307_v3, %v1018_v45  ;;  %v308_v60 = vcombine.high %v307_v3, %v960_v0  ;;  %v356_v2 = vcombine.high %v1044_v63, %v960_v0 }
  0x98   :  { %v403_v16 = vrot.slane %v183_v8, %v1012_v42  ;;  %v379_v17 = vrot.slane %v182_v9, %v1012_v42  ;;  %v218_v18 = vcombine.low %v193_v12, %v201_v14  ;;  %v371_v26 = vcombine.high %v1063_v13, %v960_v0 }
  0x99   :  { %v1071_v19 = vpop.permute.xlu1 %86  ;;  %v1073_v20 = vpop.permute.xlu0 %79  ;;  %v323_v21 = vcombine.high %v1067_v15, %v960_v0  ;;  %v219_v40 = vcombine.high %v193_v12, %v201_v14  ;;  %v322_v1 = vrot.slane %v308_v60, %v1018_v45  ;;  %v370_v3 = vrot.slane %v356_v2, %v1018_v45 }
  0x9a   :  { %v1078_v22 = vrot.slane %v379_v17, %v1018_v45  ;;  %v185_v23 = vmul.f32 %v169_v10, %v1071_v19  ;;  %v184_v24 = vmul.f32 %v165_v7, %v1073_v20  ;;  %481 = vrot.lane.b32.xlu0 %v347_v11, %s961_s0  ;;  %v1084_v25 = vrot.slane %v403_v16, %v1018_v45 }
  0x9b   :  { %479 = vrot.lane.b32.xlu1 %v323_v21, %s961_s0  ;;  %v1109_v46 = vrot.slane %v218_v18, %v1018_v45  ;;  %v233_v49 = vrot.slane %v219_v40, %v1018_v45  ;;  %v380_v7 = vcombine.high %v379_v17, %v960_v0  ;;  %v300_v14 = vcombine.high %v298_v59, %v960_v0 }
  0x9c   :  { %v210_v27 = vcombine.low %v183_v8, %v185_v23  ;;  %v451_v28 = vrot.slane %v185_v23, %v1012_v42  ;;  %v202_v29 = vcombine.low %v182_v9, %v184_v24  ;;  %v427_v30 = vrot.slane %v184_v24, %v1012_v42 }
  0x9d   :  { %v395_v31 = vcombine.high %v1078_v22, %v960_v0  ;;  %v419_v36 = vcombine.high %v1084_v25, %v960_v0  ;;  %v394_v8 = vrot.slane %v380_v7, %v1018_v45  ;;  %v404_v9 = vcombine.high %v403_v16, %v960_v0 }
  0x9e   :  { %v217_v32 = vrot.slane %v210_v27, %v1012_v42  ;;  %v209_v33 = vrot.slane %v202_v29, %v1012_v42  ;;  %v1096_v34 = vrot.slane %v427_v30, %v1018_v45  ;;  %v1099_v35 = vrot.slane %v451_v28, %v1018_v45 }
  0x9f   :  { %483 = vrot.lane.b32.xlu1 %v371_v26, %s961_s0  ;;  %485 = vrot.lane.b32.xlu0 %v395_v31, %s961_s0  ;;  %v428_v10 = vcombine.high %v427_v30, %v960_v0  ;;  %v418_v63 = vrot.slane %v404_v9, %v1018_v45  ;;  %v452_v12 = vcombine.high %v451_v28, %v960_v0 }
  0xa0   :  { %v234_v37 = vcombine.low %v209_v33, %v217_v32  ;;  %v443_v38 = vcombine.high %v1096_v34, %v960_v0  ;;  %v235_v41 = vcombine.high %v209_v33, %v217_v32  ;;  %v467_v48 = vcombine.high %v1099_v35, %v960_v0 }
  0xa1   :  { %v442_v11 = vrot.slane %v428_v10, %v1018_v45  ;;  %v466_v16 = vrot.slane %v452_v12, %v1018_v45  ;;  %v324_v17 = vcombine.high %v322_v1, %v960_v0  ;;  %v348_v18 = vcombine.high %v346_v50, %v960_v0 }
  0xa2   :  { %v1112_v47 = vrot.slane %v234_v37, %v1018_v45  ;;  %v249_v54 = vrot.slane %v235_v41, %v1018_v45  ;;  %v372_v21 = vcombine.high %v370_v3, %v960_v0  ;;  %v396_v23 = vcombine.high %v394_v8, %v960_v0 }
  0xa3   :  { %487 = vrot.lane.b32.xlu1 %v419_v36, %s961_s0  ;;  %489 = vrot.lane.b32.xlu0 %v443_v38, %s961_s0  ;;  %v420_v24 = vcombine.high %v418_v63, %v960_v0  ;;  %v444_v26 = vcombine.high %v442_v11, %v960_v0  ;;  %v468_v27 = vcombine.high %v466_v16, %v960_v0 }
  0xa4   :  { %v251_v55 = vcombine.high %v1109_v46, %v1112_v47  ;;  %v250_v56 = vcombine.low %v1109_v46, %v1112_v47  ;;  %v252_v61 = vcombine.low %v233_v49, %v249_v54  ;;  %v253_v62 = vcombine.high %v233_v49, %v249_v54  ;;  %v732_v46 = vld [vmem:[#allocation3 + $0x50] sm:$0xf] }
  0xa7   :  { %491 = vrot.lane.b32.xlu1 %v467_v48, %s961_s0  ;;  %509 = vrot.lane.b32.xlu0 %v298_v59, %s956_s23 }
  0xab   :  { %511 = vrot.lane.b32.xlu1 %v322_v1, %s956_s23  ;;  %513 = vrot.lane.b32.xlu0 %v346_v50, %s956_s23 }
  0xaf   :  { %515 = vrot.lane.b32.xlu1 %v370_v3, %s956_s23  ;;  %517 = vrot.lane.b32.xlu0 %v394_v8, %s956_s23 }
  0xb3   :  { %519 = vrot.lane.b32.xlu1 %v418_v63, %s956_s23  ;;  %521 = vrot.lane.b32.xlu0 %v442_v11, %s956_s23 }
  0xb7   :  { %523 = vrot.lane.b32.xlu1 %v466_v16, %s956_s23  ;;  %541 = vrot.lane.b32.xlu0 %v300_v14, %s962_s1 }
  0xbb   :  { %543 = vrot.lane.b32.xlu1 %v324_v17, %s962_s1  ;;  %545 = vrot.lane.b32.xlu0 %v348_v18, %s962_s1 }
  0xbf   :  { %547 = vrot.lane.b32.xlu1 %v372_v21, %s962_s1  ;;  %549 = vrot.lane.b32.xlu0 %v396_v23, %s962_s1 }
  0xc3   :  { %551 = vrot.lane.b32.xlu1 %v420_v24, %s962_s1  ;;  %553 = vrot.lane.b32.xlu0 %v444_v26, %s962_s1 }
  0xc7   :  { %555 = vrot.lane.b32.xlu1 %v468_v27, %s962_s1  ;;  %255 = vrot.lane.b32.xlu0 %v251_v55, %s961_s0 }
  0xcb   :  { %259 = vrot.lane.b32.xlu1 %v252_v61, %s956_s23 }
  0xcf   :  { %263 = vrot.lane.b32.xlu1 %v253_v62, %s962_s1 }
 0x108   :  { %v478_v28 = vpop.permute.xlu0 %477 }
 0x109   :  { %v565_v2 = vsel %vm30_vm0, %v1039_v58, %v478_v28 }
 0x10c   :  { %v482_v29 = vpop.permute.xlu0 %481 }
 0x10d   :  { %v480_v30 = vpop.permute.xlu1 %479  ;;  %v567_v60 = vsel %vm30_vm0, %v1036_v57, %v482_v29 }
 0x10e   :  { %v566_v59 = vsel %vm30_vm0, %v1067_v15, %v480_v30 }
 0x111   :  { %v484_v31 = vpop.permute.xlu1 %483  ;;  %v486_v32 = vpop.permute.xlu0 %485 }
 0x112   :  { %v568_v15 = vsel %vm30_vm0, %v1063_v13, %v484_v31  ;;  %v569_v11 = vsel %vm30_vm0, %v1078_v22, %v486_v32 }
 0x115   :  { %v488_v33 = vpop.permute.xlu1 %487  ;;  %v490_v36 = vpop.permute.xlu0 %489 }
 0x116   :  { %v570_v17 = vsel %vm30_vm0, %v1084_v25, %v488_v33  ;;  %v571_v18 = vsel %vm30_vm0, %v1096_v34, %v490_v36 }
 0x119   :  { %v492_v37 = vpop.permute.xlu1 %491  ;;  %v510_v38 = vpop.permute.xlu0 %509 }
 0x11a   :  { %v573_v57 = vsel %vm267_vm1, %v565_v2, %v510_v38  ;;  %v572_v33 = vsel %vm30_vm0, %v1099_v35, %v492_v37  ;;  %v724_v2 = vld [vmem:[#allocation3 + $0x10] sm:$0xff] }
 0x11d   :  { %v512_v39 = vpop.permute.xlu1 %511  ;;  %v514_v40 = vpop.permute.xlu0 %513 }
 0x11e   :  { %v574_v1 = vsel %vm267_vm1, %v566_v59, %v512_v39  ;;  %v575_v50 = vsel %vm267_vm1, %v567_v60, %v514_v40 }
 0x121   :  { %v516_v41 = vpop.permute.xlu1 %515  ;;  %v518_v48 = vpop.permute.xlu0 %517 }
 0x122   :  { %v576_v8 = vsel %vm267_vm1, %v568_v15, %v516_v41  ;;  %v577_v16 = vsel %vm267_vm1, %v569_v11, %v518_v48  ;;  %v726_v11 = vld [vmem:[#allocation3 + $0x20] sm:$0xff] }
 0x125   :  { %v520_v49 = vpop.permute.xlu1 %519  ;;  %v522_v54 = vpop.permute.xlu0 %521 }
 0x126   :  { %v578_v23 = vsel %vm267_vm1, %v570_v17, %v520_v49  ;;  %v579_v24 = vsel %vm267_vm1, %v571_v18, %v522_v54 }
 0x129   :  { %v524_v51 = vpop.permute.xlu1 %523  ;;  %v542_v55 = vpop.permute.xlu0 %541 }
 0x12a   :  { %v581_v9 = vsel %vm269_vm2, %v573_v57, %v542_v55  ;;  %v580_v38 = vsel %vm267_vm1, %v572_v33, %v524_v51  ;;  %v725_v57 = vld [vmem:[#allocation3 + $0x18] sm:$0xff] }
 0x12b   :  { %v592_v21 = vrot.slane %v581_v9, %v1003_v4 }
 0x12d   :  { %v544_v61 = vpop.permute.xlu1 %543  ;;  %v546_v62 = vpop.permute.xlu0 %545  ;;  %v621_v36 = vmul.f32 %v592_v21, %v1016_v44 }
 0x12e   :  { %v582_v7 = vsel %vm269_vm2, %v574_v1, %v544_v61  ;;  %v583_v3 = vsel %vm269_vm2, %v575_v50, %v546_v62  ;;  %v722_v1 = vld [vmem:[#allocation3] sm:$0xff]  ;;  %v723_v50 = vld [vmem:[#allocation3 + $0x8] sm:$0xff] }
 0x12f   :  { %v596_v58 = vrot.slane %v582_v7, %v1003_v4  ;;  %v600_v12 = vrot.slane %v583_v3, %v1003_v4  ;;  %v963_v3 = vmov 0.0|0.0   ;;  %v875_v15 = vpack.c.bf16 %v723_v50, %v722_v1 }
 0x130   :  { %874 = vmatprep.subr.bf16.mxu0 %v963_v3 }
 0x131   :  { %v548_v10 = vpop.permute.xlu1 %547  ;;  %v550_v63 = vpop.permute.xlu0 %549  ;;  %v622_v29 = vmul.f32 %v596_v58, %v1030_v53  ;;  %v623_v30 = vmul.f32 %v600_v12, %v1014_v43  ;;  %876 = vmatpush3.bf16.msra.mxu0 %v875_v15  ;;  %v727_v58 = vld [vmem:[#allocation3 + $0x28] sm:$0xff] }
 0x132   :  { %v584_v14 = vsel %vm269_vm2, %v576_v8, %v548_v10  ;;  %v585_v22 = vsel %vm269_vm2, %v577_v16, %v550_v63  ;;  %v878_v63 = vpack.c.bf16 %v725_v57, %v724_v2  ;;  %877 = vmatprep.subr.bf16.mxu0 %v963_v3  ;;  %v728_v16 = vld [vmem:[#allocation3 + $0x30] sm:$0xff] }
 0x133   :  { %v604_v13 = vrot.slane %v584_v14, %v1003_v4  ;;  %v608_v31 = vrot.slane %v585_v22, %v1003_v4  ;;  %v629_v40 = vcombine.low %v621_v36, %v623_v30 }
 0x135   :  { %v624_v26 = vmul.f32 %v604_v13, %v1028_v52  ;;  %v552_v27 = vpop.permute.xlu1 %551  ;;  %v554_v28 = vpop.permute.xlu0 %553  ;;  %v625_v48 = vmul.f32 %v608_v31, %v1051_v6  ;;  %v636_v51 = vrot.slane %v629_v40, %v1012_v42  ;;  %879 = vmatpush3.bf16.msra.mxu0 %v878_v63  ;;  %v729_v13 = vld [vmem:[#allocation3 + $0x38] sm:$0xff] }
 0x136   :  { %v586_v25 = vsel %vm269_vm2, %v578_v23, %v552_v27  ;;  %v587_v34 = vsel %vm269_vm2, %v579_v24, %v554_v28  ;;  %880 = vmatprep.subr.bf16.mxu0 %v963_v3  ;;  %v884_v22 = vpack.c.bf16 %v729_v13, %v728_v16  ;;  %v730_v24 = vld [vmem:[#allocation3 + $0x40] sm:$0xff] }
 0x137   :  { %v616_v32 = vrot.slane %v587_v34, %v1003_v4  ;;  %v637_v52 = vcombine.low %v622_v29, %v624_v26  ;;  %v612_v53 = vrot.slane %v586_v25, %v1003_v4  ;;  %v731_v26 = vld [vmem:[#allocation3 + $0x48] sm:$0xff] }
 0x138   :  { %v887_v27 = vpack.c.bf16 %v731_v26, %v730_v24 }
 0x139   :  { %v627_v43 = vmul.f32 %v616_v32, %v1073_v20  ;;  %v556_v39 = vpop.permute.xlu1 %555  ;;  %v644_v54 = vrot.slane %v637_v52, %v1012_v42  ;;  %v626_v35 = vmul.f32 %v612_v53, %v1049_v5  ;;  %v256_v12 = vpop.permute.xlu0 %255  ;;  %v834_v32 = vld [vmem:[%s1242_s2] ss:$0 sm:$0xff] }
 0x13a   :  { %v588_v41 = vsel %vm269_vm2, %v580_v38, %v556_v39  ;;  %v266_v18 = vsel %vm30_vm0, %v250_v56, %v256_v12 }
 0x13b   :  { %v620_v49 = vrot.slane %v588_v41, %v1003_v4  ;;  %v645_v44 = vcombine.low %v625_v48, %v627_v43  ;;  %v662_v59 = vcombine.high %v636_v51, %v644_v54  ;;  %v661_v61 = vcombine.low %v636_v51, %v644_v54 }
 0x13d   :  { %v628_v37 = vmul.f32 %v620_v49, %v1071_v19  ;;  %v652_v20 = vrot.slane %v645_v44, %v1012_v42  ;;  %v676_v4 = vrot.slane %v662_v59, %v1018_v45  ;;  %v669_v19 = vrot.slane %v661_v61, %v1018_v45  ;;  %v260_v8 = vpop.permute.xlu1 %259 }
 0x13e   :  { %v268_v21 = vsel %vm267_vm1, %v266_v18, %v260_v8 }
 0x13f   :  { %v653_v55 = vcombine.low %v626_v35, %v628_v37 }
 0x141   :  { %v660_v60 = vrot.slane %v653_v55, %v1012_v42  ;;  %v264_v17 = vpop.permute.xlu1 %263 }
 0x142   :  { %v270_v23 = vsel %vm269_vm2, %v268_v21, %v264_v17 }
 0x143   :  { %v678_v62 = vcombine.high %v652_v20, %v660_v60  ;;  %v677_v6 = vcombine.low %v652_v20, %v660_v60 }
 0x145   :  { %v692_v5 = vrot.slane %v678_v62, %v1018_v45  ;;  %v685_v7 = vrot.slane %v677_v6, %v1018_v45  ;;  %v881_v45 = vpack.c.bf16 %v727_v58, %v726_v11 }
 0x147   :  { %v696_v42 = vcombine.high %v676_v4, %v692_v5  ;;  %v694_v9 = vcombine.high %v669_v19, %v685_v7  ;;  %v693_v10 = vcombine.low %v669_v19, %v685_v7  ;;  %v695_v14 = vcombine.low %v676_v4, %v692_v5  ;;  %882 = vmatpush3.bf16.msra.mxu0 %v881_v45 }
 0x148   :  { %883 = vmatprep.subr.bf16.mxu0 %v963_v3 }
 0x149   :  { %706 = vrot.lane.b32.xlu1 %v696_v42, %s964_s28  ;;  %698 = vrot.lane.b32.xlu0 %v694_v9, %s965_s29 }
 0x14b   :  { %885 = vmatpush3.bf16.msra.mxu0 %v884_v22 }
 0x14c   :  { %886 = vmatprep.subr.bf16.mxu0 %v963_v3 }
 0x14d   :  { %702 = vrot.lane.b32.xlu0 %v695_v14, %s966_s30 }
 0x14f   :  { %888 = vmatpush3.bf16.msra.mxu0 %v887_v27 }
 0x150   :  { %869 = vmatprep.subr.mxu0 %v960_v0 }
 0x151   :  { %272 = vrot.lane.b32.xlu0 %v270_v23, %s961_s0 }
 0x153   :  { %870 = vmatpush3.msk.msra.mxu0 %vm744_vm4, %v732_v46 }
 0x1bb   :  { %v699_v47 = vpop.permute.xlu0 %698  ;;  %v707_v29 = vpop.permute.xlu1 %706 }
 0x1bc   :  { %v710_v56 = vsel %vm709_vm5, %v693_v10, %v699_v47 }
 0x1bf   :  { %v703_v28 = vpop.permute.xlu0 %702 }
 0x1c0   :  { %v712_v30 = vsel %vm711_vm6, %v710_v56, %v703_v28 }
 0x1c1   :  { %v714_v25 = vsel %vm713_vm7, %v712_v30, %v707_v29 }
 0x1c2   :  { %716 = vrot.lane.b32.xlu1 %v714_v25, %s968_s4 }
 0x1c3   :  { %v273_v34 = vpop.permute.xlu0 %272 }
 0x1c4   :  { %276 = vst.msk [vmem:[#allocation2] sm:$0xff] %vm275_vm8, %v273_v34 }
 0x234   :  { %v717_v31 = vpop.permute.xlu1 %716 }
 0x235   :  { %720 = vst.msk [vmem:[#allocation2] sm:$0xff] %vm719_vm9, %v717_v31 }
 0x23c   :  { %v721_v0 = vld [vmem:[#allocation2] sm:$0xff] }
 0x23d   :  { %872 = vmatmul.mubr.msk.f32.vlgmr.msra.gmra.mrb[0].mxu0 %vm740_vm10, %v721_v0 }
 0x310   :  { %v814_v33 = vpop.f32.mrb[0].mxu0 }
 0x311   :  { %v815_v36 = vadd.f32 %v834_v32, %v814_v33  ;;  %v873_v52 = vpop.f32.mrb[1].mxu0 }
 0x313   :  { %818 = vst [vmem:[#allocation6] sm:$0xff] %v815_v36 }
 0x314   :  { %939 = shalt.err (!%p936_p12)
}
 0x315   :  { %s940_s12 = scalar_lea.hbm %s1243_s3, 128 }
 0x316   :  { %p941_p13 = scmp.ne.s32.totalorder %s1243_s3, %s940_s12  ;;  %p944_p0 = scmp.lt.u32.totalorder %s940_s12, %s1243_s3 }
 0x318   :  { %p946_p1 = pnand %p944_p0, %p941_p13 }
 0x31a   :  { %949 = shalt.err (!%p946_p1)
}
 0x31b   :  { %828 = dma.vmem_to_hbm [thread:$0]  %s826_s8, 128, %s1243_s3, [#allocation5]  }
 0x31c   :  { %952 = dma.done.wait [#allocation5], 128  }
 0x31d   :  { %953 = vsyncadd [#allocation5], 4294967168 }
 0x31e   :  { %832 = vsyncpa [#allocation4], 1 }
 0x31f   :  { %833 = vsyncpa [#allocation5], 1 }

</bundles_post_ra>
